<compile_context>
chip_gen: v7x
topology: tpu7x:2x2x1
jax: 0.10.0
libtpu: 0.0.40
codegen_flags: <defaults>
</compile_context>

<pallas_src>
import functools
import math

import numpy as np
import jax
import jax.numpy as jnp
from jax.experimental import pallas as pl
from jax.experimental.pallas import tpu as pltpu


# ---------------------------------------------------------------------------
# Zernike coefficient construction (plain Python, matches the PyTorch __init__)
# ---------------------------------------------------------------------------
def generate_radial_polynomial(max_n, polynomial_coefficient, n, m):
    res = [0.0] * (max_n + 1)
    if (n - m) % 2 == 1:
        return res
    mid_nm = int((n + abs(m)) / 2)
    delta_nm = int((n - abs(m)) / 2)
    for k in range(0, delta_nm + 1):
        k_factorial = math.factorial(k)
        mid_factorial = math.factorial(mid_nm - k)
        delta_factorial = math.factorial(delta_nm - k)
        delta_nk_factorial = math.factorial(n - k)
        fac_rho = pow(-1, k) * delta_nk_factorial
        fac_div = k_factorial * mid_factorial * delta_factorial
        fac_rho = fac_rho / fac_div
        rho_index = n - 2 * k
        res[rho_index] = polynomial_coefficient * fac_rho
    return res


def get_radial_polynomial_coefficients(n, m):
    if (n - m) % 2 == 1:
        return 0
    if m == 0:
        return n + 1
    else:
        return 2 * (n + 1)


def build_zernike_params(max_n, list_mn, theta_list, wgt_list):
    """Replicates the buffer construction from the PyTorch module __init__."""
    rcu_coefficients_list = []
    acu_theta_list = []
    theta_arr = np.asarray(theta_list)
    for i in range(len(list_mn)):
        m, n = list_mn[i]
        polynomial_coefficient = get_radial_polynomial_coefficients(n=n, m=m)
        radial_polynomial = generate_radial_polynomial(
            max_n=max_n - 1,
            polynomial_coefficient=wgt_list[i] * np.sqrt(polynomial_coefficient),
            n=n,
            m=m,
        )
        rcu_coefficients_list.append(radial_polynomial)
        if m >= 0:
            acu_theta_list.append(np.cos(m * theta_arr).tolist())
        else:
            acu_theta_list.append(np.sin(abs(m) * theta_arr).tolist())
    rcu_coefficients = np.asarray(rcu_coefficients_list, dtype=np.float32)  # (S, N)
    acu_theta = np.asarray(acu_theta_list, dtype=np.float32)                # (S, P)
    return rcu_coefficients, acu_theta


# ---------------------------------------------------------------------------
# One-time host precompute: fold + pad + lane/sublane-dense reshape.
# Both rcu_coefficients and acu_theta (and rho) are fixed module buffers, so
# everything here is done once at module construction time, never per-forward.
# ---------------------------------------------------------------------------
def prepare_zernike_buffers(rho_np, rcu_coeff, acu_theta, *, max_tile_rows=1024):
    """Returns (rho2d, w3d, tile_rows):
        rho2d : (rows_padded, 128) f32
        w3d   : (max_n, rows_padded, 128) f32  with w[n,p] = sum_s rcu[s,n]*acu[s,p]
    Padding lanes are zero; tile_rows always divides rows_padded.
    """
    assert max_tile_rows % 8 == 0
    full_size = int(rho_np.shape[0])
    max_n = rcu_coeff.shape[1]

    # Exact f64 fold of the two fixed coefficient buffers.
    w = rcu_coeff.astype(np.float64).T @ acu_theta.astype(np.float64)       # (N, P)
    w = w.astype(np.float32)

    rows = -(-full_size // 128)                       # ceil(P / 128)
    if rows <= max_tile_rows:
        tile_rows = rows                              # single full-extent block
        rows_padded = rows
    else:
        tile_rows = max_tile_rows
        rows_padded = -(-rows // tile_rows) * tile_rows
    padded = rows_padded * 128

    rho_p = np.zeros((padded,), dtype=np.float32)
    rho_p[:full_size] = rho_np
    w_p = np.zeros((max_n, padded), dtype=np.float32)
    w_p[:, :full_size] = w

    rho2d = jnp.asarray(rho_p.reshape(rows_padded, 128))
    w3d = jnp.asarray(w_p.reshape(max_n, rows_padded, 128))
    return rho2d, w3d, tile_rows


# ---------------------------------------------------------------------------
# Pallas kernel: fig[p] = sum_n rho[p]^n * w[n, p]  via Horner (pure VPU FMAs)
# ---------------------------------------------------------------------------
def zernike_kernel(rho_ref, w_ref, fig_ref, *, max_n):
    # rho_ref: (TR, 128)          rho values for this tile (sublane+lane dense)
    # w_ref:   (max_n, TR, 128)   folded coefficients
    # fig_ref: (TR, 128)          output
    rho = rho_ref[...]
    acc = w_ref[max_n - 1]                       # (TR, 128)
    for n in range(max_n - 2, -1, -1):           # unrolled Horner chain
        acc = acc * rho + w_ref[n]
    fig_ref[...] = acc


def zernike_forward(rho2d, w3d, *, tile_rows):
    """rho2d: (rows, 128) f32, w3d: (max_n, rows, 128) f32 -> fig: (rows, 128) f32.

    Returns the padded, 2-D (sublane/lane-dense) result; flatten+slice to the
    original point count on the host if a flat vector is needed.
    """
    rows, lanes = rho2d.shape
    assert lanes == 128
    max_n = w3d.shape[0]
    assert rows % tile_rows == 0
    grid = rows // tile_rows

    return pl.pallas_call(
        functools.partial(zernike_kernel, max_n=max_n),
        out_shape=jax.ShapeDtypeStruct((rows, 128), jnp.float32),
        grid_spec=pl.GridSpec(
            grid=(grid,),
            in_specs=[
                pl.BlockSpec((tile_rows, 128), lambda i: (i, 0)),          # rho tile
                pl.BlockSpec((max_n, tile_rows, 128), lambda i: (0, i, 0)),  # w tile
            ],
            out_specs=pl.BlockSpec((tile_rows, 128), lambda i: (i, 0)),
        ),
        compiler_params=pltpu.CompilerParams(
            dimension_semantics=("parallel",)),   # shards grid across v7x's 2 TCs
    )(rho2d, w3d)


# ---------------------------------------------------------------------------
# Main
# ---------------------------------------------------------------------------
if __name__ == "__main__":
    max_n = 8                     # max radial degree is max_n - 1 = 7
    full_size = 256               # number of (rho, theta) sample points (small demo)

    # All valid (m, n) Zernike index pairs with n < max_n.
    list_mn = [(m, n) for n in range(max_n) for m in range(-n, n + 1, 2)]
    max_s = len(list_mn)          # 36

    key = jax.random.PRNGKey(0)
    k_rho, k_theta = jax.random.split(key)
    rho_np = np.asarray(jax.random.uniform(k_rho, (full_size,),
                                           minval=0.0, maxval=1.0),
                        dtype=np.float32)
    theta_np = np.asarray(jax.random.uniform(k_theta, (full_size,),
                                             minval=0.0, maxval=2.0 * np.pi),
                          dtype=np.float32)
    wgt_list = [1.0 + 0.01 * i for i in range(max_s)]   # deterministic weights

    rcu_coeff_np, acu_theta_np = build_zernike_params(
        max_n, list_mn, theta_np.tolist(), wgt_list)

    # One-time fold + pad + dense reshape of the fixed buffers (host side).
    rho2d, w3d, tile_rows = prepare_zernike_buffers(
        rho_np, rcu_coeff_np, acu_theta_np, max_tile_rows=1024)

    fig2d = zernike_forward(rho2d, w3d, tile_rows=tile_rows)
    fig2d = jax.block_until_ready(fig2d)
    fig = np.asarray(fig2d).reshape(-1)[:full_size]

    # Pure-numpy f64 reference of the ORIGINAL (unfolded) PyTorch forward.
    powers = rho_np[:, None].astype(np.float64) ** np.arange(max_n)[None, :]
    bm_ref = powers @ rcu_coeff_np.astype(np.float64).T          # (P, S)
    fig_ref = (bm_ref * acu_theta_np.astype(np.float64).T).sum(axis=1)

    np.testing.assert_allclose(fig, fig_ref, rtol=1e-4, atol=1e-3)
    print("KERNEL_OK")
</pallas_src>

<mosaic_0001>
module attributes {stable_mosaic.version = 11 : i64} {
  func.func @zernike_kernel(%arg0: i32, %arg1: memref<2x128xf32, #tpu.memory_space<vmem>>, %arg2: memref<8x2x128xf32, #tpu.memory_space<vmem>>, %arg3: memref<2x128xf32, #tpu.memory_space<vmem>>) attributes {dimension_semantics = [#tpu.dimension_semantics<parallel>], iteration_bounds = array<i64: 1>, scalar_prefetch = 0 : i64, scratch_operands = 0 : i64, tpu.core_type = #tpu.core_type<tc>, window_params = [{transform_indices = @transform_0, window_bounds = array<i64: 2, 128>}, {transform_indices = @transform_1, window_bounds = array<i64: 8, 2, 128>}, {transform_indices = @transform_2, window_bounds = array<i64: 2, 128>}]} {
    %c0 = arith.constant 0 : index
    %c0_0 = arith.constant 0 : index
    %0 = vector.load %arg1[%c0, %c0_0] : memref<2x128xf32, #tpu.memory_space<vmem>>, vector<2x128xf32>
    %c7 = arith.constant 7 : index
    %c0_1 = arith.constant 0 : index
    %c0_2 = arith.constant 0 : index
    %1 = vector.load %arg2[%c7, %c0_1, %c0_2] : memref<8x2x128xf32, #tpu.memory_space<vmem>>, vector<1x2x128xf32>
    %2 = vector.shape_cast %1 : vector<1x2x128xf32> to vector<2x128xf32>
    %3 = arith.mulf %2, %0 : vector<2x128xf32>
    %c6 = arith.constant 6 : index
    %c0_3 = arith.constant 0 : index
    %c0_4 = arith.constant 0 : index
    %4 = vector.load %arg2[%c6, %c0_3, %c0_4] : memref<8x2x128xf32, #tpu.memory_space<vmem>>, vector<1x2x128xf32>
    %5 = vector.shape_cast %4 : vector<1x2x128xf32> to vector<2x128xf32>
    %6 = arith.addf %3, %5 : vector<2x128xf32>
    %7 = arith.mulf %6, %0 : vector<2x128xf32>
    %c5 = arith.constant 5 : index
    %c0_5 = arith.constant 0 : index
    %c0_6 = arith.constant 0 : index
    %8 = vector.load %arg2[%c5, %c0_5, %c0_6] : memref<8x2x128xf32, #tpu.memory_space<vmem>>, vector<1x2x128xf32>
    %9 = vector.shape_cast %8 : vector<1x2x128xf32> to vector<2x128xf32>
    %10 = arith.addf %7, %9 : vector<2x128xf32>
    %11 = arith.mulf %10, %0 : vector<2x128xf32>
    %c4 = arith.constant 4 : index
    %c0_7 = arith.constant 0 : index
    %c0_8 = arith.constant 0 : index
    %12 = vector.load %arg2[%c4, %c0_7, %c0_8] : memref<8x2x128xf32, #tpu.memory_space<vmem>>, vector<1x2x128xf32>
    %13 = vector.shape_cast %12 : vector<1x2x128xf32> to vector<2x128xf32>
    %14 = arith.addf %11, %13 : vector<2x128xf32>
    %15 = arith.mulf %14, %0 : vector<2x128xf32>
    %c3 = arith.constant 3 : index
    %c0_9 = arith.constant 0 : index
    %c0_10 = arith.constant 0 : index
    %16 = vector.load %arg2[%c3, %c0_9, %c0_10] : memref<8x2x128xf32, #tpu.memory_space<vmem>>, vector<1x2x128xf32>
    %17 = vector.shape_cast %16 : vector<1x2x128xf32> to vector<2x128xf32>
    %18 = arith.addf %15, %17 : vector<2x128xf32>
    %19 = arith.mulf %18, %0 : vector<2x128xf32>
    %c2 = arith.constant 2 : index
    %c0_11 = arith.constant 0 : index
    %c0_12 = arith.constant 0 : index
    %20 = vector.load %arg2[%c2, %c0_11, %c0_12] : memref<8x2x128xf32, #tpu.memory_space<vmem>>, vector<1x2x128xf32>
    %21 = vector.shape_cast %20 : vector<1x2x128xf32> to vector<2x128xf32>
    %22 = arith.addf %19, %21 : vector<2x128xf32>
    %23 = arith.mulf %22, %0 : vector<2x128xf32>
    %c1 = arith.constant 1 : index
    %c0_13 = arith.constant 0 : index
    %c0_14 = arith.constant 0 : index
    %24 = vector.load %arg2[%c1, %c0_13, %c0_14] : memref<8x2x128xf32, #tpu.memory_space<vmem>>, vector<1x2x128xf32>
    %25 = vector.shape_cast %24 : vector<1x2x128xf32> to vector<2x128xf32>
    %26 = arith.addf %23, %25 : vector<2x128xf32>
    %27 = arith.mulf %26, %0 : vector<2x128xf32>
    %c0_15 = arith.constant 0 : index
    %c0_16 = arith.constant 0 : index
    %c0_17 = arith.constant 0 : index
    %28 = vector.load %arg2[%c0_15, %c0_16, %c0_17] : memref<8x2x128xf32, #tpu.memory_space<vmem>>, vector<1x2x128xf32>
    %29 = vector.shape_cast %28 : vector<1x2x128xf32> to vector<2x128xf32>
    %30 = arith.addf %27, %29 : vector<2x128xf32>
    %c0_18 = arith.constant 0 : index
    %c0_19 = arith.constant 0 : index
    %31 = vector.load %arg3[%c0_18, %c0_19] : memref<2x128xf32, #tpu.memory_space<vmem>>, vector<2x128xf32>
    tpu.vector_store %arg3[%c0_18, %c0_19], %30 {strides = array<i32>} : memref<2x128xf32, #tpu.memory_space<vmem>>, vector<2x128xf32>,
    return
  }
  func.func @transform_0(%arg0: i32) -> (i32, i32) {
    %c0_i32 = arith.constant 0 : i32
    %c0_i32_0 = arith.constant 0 : i32
    return %arg0, %c0_i32 : i32, i32
  }
  func.func @transform_1(%arg0: i32) -> (i32, i32, i32) {
    %c0_i32 = arith.constant 0 : i32
    %c0_i32_0 = arith.constant 0 : i32
    %c0_i32_1 = arith.constant 0 : i32
    return %c0_i32, %arg0, %c0_i32_0 : i32, i32, i32
  }
  func.func @transform_2(%arg0: i32) -> (i32, i32) {
    %c0_i32 = arith.constant 0 : i32
    %c0_i32_0 = arith.constant 0 : i32
    return %arg0, %c0_i32 : i32, i32
  }
}

</mosaic_0001>

<bundles_post_ra>
// kernel: tpu_custom_call.1
= control target key start
LH: loop header
LB: loop body
LE: loop exit
PB: predicated region body
PF: predicated region fallthrough
CT: control target
= control target key end

     0   :  { %7 = vsyncpa [#allocation3], 0  ;;  %s225_s0 = inlined_call_operand.hbm [shape: f32[2,128], index: 0, kind: input, shape index: {}]   ;;  %s226_s1 = inlined_call_operand.hbm [shape: f32[8,2,128], index: 1, kind: input, shape index: {}]   ;;  %s227_s2 = inlined_call_operand.hbm [shape: f32[2,128], index: 2, kind: output, shape index: {}]  }
   0x1   :  { %8 = vsyncpa [#allocation6], 0 }
   0x2   :  { %9 = vsyncpa [#allocation4], 0  ;;  %s162_s9 = smov [#allocation2]   ;;  %s163_s11 = smov [#allocation5]  }
   0x3   :  { %s16_s10 = sshll.u32 %s162_s9, 4  ;;  %s25_s12 = sshll.u32 %s163_s11, 4  ;;  %s17_s10 = int_to_ptr.vmem [resolvable:$true] %s16_s10  ;;  %s182_s12 = int_to_ptr.vmem [resolvable:$true] %s25_s12 }
   0x4   :  { %s90_s15 = scalar_lea.hbm %s225_s0, 32 }
   0x5   :  { %p91_p0 = scmp.ne.s32.totalorder %s225_s0, %s90_s15  ;;  %p94_p1 = scmp.lt.u32.totalorder %s90_s15, %s225_s0 }
   0x7   :  { %p96_p2 = pnand %p94_p1, %p91_p0 }
   0x9   :  { %99 = shalt.err (!%p96_p2)
}
   0xa   :  { %s100_s20 = scalar_lea.vmem %s17_s10, 32  ;;  %p105_p4 = scmp.lt.s32.totalorder %s17_s10, %s17_s10 }
   0xb   :  { %p101_p3 = scmp.ne.s32.totalorder %s17_s10, %s100_s20  ;;  %p106_p5 = scmp.lt.s32.totalorder %s100_s20, %s100_s20 }
   0xd   :  { %p107_p6 = por %p106_p5, %p105_p4 }
   0xf   :  { %p108_p7 = pnand %p107_p6, %p101_p3 }
  0x11   :  { %111 = shalt.err (!%p108_p7)
}
  0x12   :  { %19 = dma.hbm_to_vmem [thread:$0]  %s225_s0, 32, %s17_s10, [#allocation3]  }
  0x13   :  { %s112_s25 = scalar_lea.hbm %s226_s1, 256 }
  0x14   :  { %p113_p8 = scmp.ne.s32.totalorder %s226_s1, %s112_s25  ;;  %p116_p9 = scmp.lt.u32.totalorder %s112_s25, %s226_s1 }
  0x16   :  { %p118_p10 = pnand %p116_p9, %p113_p8 }
  0x18   :  { %121 = shalt.err (!%p118_p10)
}
  0x19   :  { %s122_s30 = scalar_lea.vmem %s182_s12, 256  ;;  %p127_p12 = scmp.lt.s32.totalorder %s182_s12, %s182_s12 }
  0x1a   :  { %p123_p11 = scmp.ne.s32.totalorder %s182_s12, %s122_s30  ;;  %p128_p13 = scmp.lt.s32.totalorder %s122_s30, %s122_s30 }
  0x1c   :  { %p129_p0 = por %p128_p13, %p127_p12 }
  0x1e   :  { %p130_p1 = pnand %p129_p0, %p123_p11 }
  0x20   :  { %133 = shalt.err (!%p130_p1)
}
  0x21   :  { %s164_s0 = smov 32   ;;  %s165_s3 = smov 2  }
  0x22   :  { %31 = dma.hbm_to_vmem [thread:$0]  %s226_s1, 256, %s182_s12, [#allocation6], %s164_s0, %s164_s0, %s165_s3  }
  0x23   :  { %156 = dma.done.wait [#allocation3], 32  }
  0x24   :  { %157 = vsyncadd [#allocation3], 4294967264 }
  0x25   :  { %158 = dma.done.wait [#allocation6], 256  }
  0x26   :  { %159 = vsyncadd [#allocation6], 4294967040  ;;  %v38_v0 = vld [vmem:[#allocation2] sm:$0x3]  ;;  %v40_v1 = vld [vmem:[#allocation5 + $0xe] sm:$0x3] }
  0x27   :  { %v43_v2 = vld [vmem:[#allocation5 + $0xc] sm:$0x3]  ;;  %v41_v3 = vmul.f32 %v40_v1, %v38_v0  ;;  %v47_v5 = vld [vmem:[#allocation5 + $0xa] sm:$0x3]  ;;  %v51_v8 = vld [vmem:[#allocation5 + $0x8] sm:$0x3] }
  0x28   :  { %v55_v11 = vld [vmem:[#allocation5 + $0x6] sm:$0x3]  ;;  %v59_v14 = vld [vmem:[#allocation5 + $0x4] sm:$0x3]  ;;  %v63_v17 = vld [vmem:[#allocation5 + $0x2] sm:$0x3] }
  0x29   :  { %v44_v4 = vadd.f32 %v43_v2, %v41_v3  ;;  %v66_v20 = vld [vmem:[#allocation5] sm:$0x3]  ;;  %s166_s1 = smov [#allocation7]  }
  0x2a   :  { %s75_s6 = sshll.u32 %s166_s1, 4  ;;  %s76_s6 = int_to_ptr.vmem [resolvable:$true] %s75_s6 }
  0x2b   :  { %v45_v6 = vmul.f32 %v44_v4, %v38_v0  ;;  %s134_s7 = scalar_lea.vmem %s76_s6, 32  ;;  %p139_p3 = scmp.lt.s32.totalorder %s76_s6, %s76_s6 }
  0x2c   :  { %p135_p2 = scmp.ne.s32.totalorder %s76_s6, %s134_s7  ;;  %p140_p4 = scmp.lt.s32.totalorder %s134_s7, %s134_s7 }
  0x2d   :  { %v48_v7 = vadd.f32 %v47_v5, %v45_v6 }
  0x2e   :  { %p141_p5 = por %p140_p4, %p139_p3 }
  0x2f   :  { %v49_v9 = vmul.f32 %v48_v7, %v38_v0 }
  0x30   :  { %p142_p6 = pnand %p141_p5, %p135_p2 }
  0x31   :  { %v52_v10 = vadd.f32 %v51_v8, %v49_v9 }
  0x33   :  { %v53_v12 = vmul.f32 %v52_v10, %v38_v0 }
  0x35   :  { %v56_v13 = vadd.f32 %v55_v11, %v53_v12 }
  0x37   :  { %v57_v15 = vmul.f32 %v56_v13, %v38_v0 }
  0x39   :  { %v60_v16 = vadd.f32 %v59_v14, %v57_v15 }
  0x3b   :  { %v61_v18 = vmul.f32 %v60_v16, %v38_v0 }
  0x3d   :  { %v64_v19 = vadd.f32 %v63_v17, %v61_v18 }
  0x3f   :  { %v65_v21 = vmul.f32 %v64_v19, %v38_v0 }
  0x41   :  { %v67_v22 = vadd.f32 %v66_v20, %v65_v21 }
  0x43   :  { %68 = vst [vmem:[#allocation7] sm:$0x3] %v67_v22 }
  0x44   :  { %145 = shalt.err (!%p142_p6)
}
  0x45   :  { %s146_s10 = scalar_lea.hbm %s227_s2, 32 }
  0x46   :  { %p147_p7 = scmp.ne.s32.totalorder %s227_s2, %s146_s10  ;;  %p150_p8 = scmp.lt.u32.totalorder %s146_s10, %s227_s2 }
  0x48   :  { %p152_p9 = pnand %p150_p8, %p147_p7 }
  0x4a   :  { %155 = shalt.err (!%p152_p9)
}
  0x4b   :  { %78 = dma.vmem_to_hbm [thread:$0]  %s76_s6, 32, %s227_s2, [#allocation4]  }
  0x4c   :  { %160 = dma.done.wait [#allocation4], 32  }
  0x4d   :  { %161 = vsyncadd [#allocation4], 4294967264 }
  0x4e   :  { %82 = vsyncpa [#allocation3], 1 }
  0x4f   :  { %83 = vsyncpa [#allocation6], 1 }
  0x50   :  { %84 = vsyncpa [#allocation4], 1 }

</bundles_post_ra>
